<compile_context>
chip_gen: v7x
topology: tpu7x:2x2x1
jax: 0.10.0
libtpu: 0.0.40
codegen_flags: <defaults>
</compile_context>

<pallas_src>
import jax
import jax.numpy as jnp
from jax.experimental import pallas as pl
from jax.experimental.pallas import tpu as pltpu

LANE = 128     # lane width (last-dim tiling unit, f32)
SUBLANE = 8    # sublane width (second-to-last dim, f32)


def mlp_kernel(x_ref, w1_ref, b1_ref, w2_ref, b2_ref, o_ref):
    # One batch tile per grid step. Weight/bias index_maps always return
    # block (0, 0), so those tiles are VMEM-resident across the whole grid.
    x = x_ref[...]                                          # (TB, 20)
    h = jnp.dot(x, w1_ref[...],
                preferred_element_type=jnp.float32)         # (TB, 256)  MXU
    h = jnp.maximum(h + b1_ref[...], 0.0)                   # bias + ReLU, f32 VPU
    y = jnp.dot(h.astype(w2_ref.dtype), w2_ref[...],
                preferred_element_type=jnp.float32)         # (TB, 128)  MXU
    o_ref[...] = (y + b2_ref[...]).astype(o_ref.dtype)      # lane-dense store


def my_sequential_forward(x, w1, b1, w2, b2, *, batch_tile=None):
    B, in_dim = x.shape
    hidden = w1.shape[1]
    out_dim = w2.shape[1]
    dtype = x.dtype

    # Lane-dense output: pad N (=10) up to a multiple of 128 with zero columns
    # so the final store is an unmasked vst; sliced back below.
    n_out = ((out_dim + LANE - 1) // LANE) * LANE
    w2p = jnp.pad(w2, ((0, 0), (0, n_out - out_dim)))
    b2p = jnp.pad(b2, ((0, 0), (0, n_out - out_dim)))

    # Batch tile: multiple of the f32 sublane (8), capped at 512 so the
    # per-step VMEM footprint stays tiny on v7x's 64 MiB VMEM as well.
    if batch_tile is None:
        batch_tile = min(512, max(SUBLANE,
                                  ((B + SUBLANE - 1) // SUBLANE) * SUBLANE))
    tb = batch_tile
    Bp = ((B + tb - 1) // tb) * tb
    xp = jnp.pad(x, ((0, Bp - B), (0, 0)))          # padded rows are sliced off

    out = pl.pallas_call(
        mlp_kernel,
        out_shape=jax.ShapeDtypeStruct((Bp, n_out), dtype),
        grid=(Bp // tb,),
        in_specs=[
            # activations: one batch tile per grid step
            pl.BlockSpec((tb, in_dim), lambda i: (i, 0),
                         memory_space=pltpu.MemorySpace.VMEM),
            # weights/biases: VMEM-resident (same block every step)
            pl.BlockSpec((in_dim, hidden), lambda i: (0, 0),
                         memory_space=pltpu.MemorySpace.VMEM),
            pl.BlockSpec((1, hidden), lambda i: (0, 0),
                         memory_space=pltpu.MemorySpace.VMEM),
            pl.BlockSpec((hidden, n_out), lambda i: (0, 0),
                         memory_space=pltpu.MemorySpace.VMEM),
            pl.BlockSpec((1, n_out), lambda i: (0, 0),
                         memory_space=pltpu.MemorySpace.VMEM),
        ],
        out_specs=pl.BlockSpec((tb, n_out), lambda i: (i, 0),
                               memory_space=pltpu.MemorySpace.VMEM),
        compiler_params=pltpu.CompilerParams(
            # v7x: shard independent batch tiles across both TensorCores.
            dimension_semantics=("parallel",),
        ),
    )(xp, w1, b1, w2p, b2p)

    return out[:B, :out_dim]


def init_params(key, in_dim=20, hidden=256, out_dim=10, dtype=jnp.float32):
    # Deterministic init mimicking nn.Linear's U(-1/sqrt(fan_in), 1/sqrt(fan_in)).
    k1, k2, k3, k4 = jax.random.split(key, 4)
    bound1 = 1.0 / jnp.sqrt(in_dim)
    bound2 = 1.0 / jnp.sqrt(hidden)
    w1 = jax.random.uniform(k1, (in_dim, hidden), dtype, -bound1, bound1)
    b1 = jax.random.uniform(k2, (1, hidden), dtype, -bound1, bound1)
    w2 = jax.random.uniform(k3, (hidden, out_dim), dtype, -bound2, bound2)
    b2 = jax.random.uniform(k4, (1, out_dim), dtype, -bound2, bound2)
    return w1, b1, w2, b2


def _ref_forward(x, w1, b1, w2, b2):
    return jnp.maximum(x @ w1 + b1, 0.0) @ w2 + b2


if __name__ == "__main__":
    key = jax.random.PRNGKey(0)
    kx, kp, kb = jax.random.split(key, 3)
    w1, b1, w2, b2 = init_params(kp)

    # X = torch.rand(2, 20)  ->  uniform [0, 1), shape (2, 20)
    x = jax.random.uniform(kx, (2, 20), jnp.float32)
    y = jax.block_until_ready(my_sequential_forward(x, w1, b1, w2, b2))
    y_ref = _ref_forward(x, w1, b1, w2, b2)
    assert y.shape == (2, 10)
    assert jnp.allclose(y, y_ref, atol=1e-5, rtol=1e-5)

    # Exercise the multi-step batch grid path (weights resident, 3 tiles).
    xb = jax.random.uniform(kb, (24, 20), jnp.float32)
    yb = jax.block_until_ready(
        my_sequential_forward(xb, w1, b1, w2, b2, batch_tile=8))
    yb_ref = _ref_forward(xb, w1, b1, w2, b2)
    assert yb.shape == (24, 10)
    assert jnp.allclose(yb, yb_ref, atol=1e-5, rtol=1e-5)

    print("KERNEL_OK")
</pallas_src>

<mosaic_0001>
module attributes {stable_mosaic.version = 11 : i64} {
  func.func @mlp_kernel(%arg0: i32, %arg1: memref<8x20xf32, #tpu.memory_space<vmem>>, %arg2: memref<20x256xf32, #tpu.memory_space<vmem>>, %arg3: memref<1x256xf32, #tpu.memory_space<vmem>>, %arg4: memref<256x128xf32, #tpu.memory_space<vmem>>, %arg5: memref<1x128xf32, #tpu.memory_space<vmem>>, %arg6: memref<8x128xf32, #tpu.memory_space<vmem>>) attributes {dimension_semantics = [#tpu.dimension_semantics<parallel>], iteration_bounds = array<i64: 1>, scalar_prefetch = 0 : i64, scratch_operands = 0 : i64, tpu.core_type = #tpu.core_type<tc>, window_params = [{transform_indices = @transform_0, window_bounds = array<i64: 8, 20>}, {pipeline_mode = #tpu.pipeline_mode<synchronous>, transform_indices = @transform_1, window_bounds = array<i64: 20, 256>}, {pipeline_mode = #tpu.pipeline_mode<synchronous>, transform_indices = @transform_2, window_bounds = array<i64: 1, 256>}, {pipeline_mode = #tpu.pipeline_mode<synchronous>, transform_indices = @transform_3, window_bounds = array<i64: 256, 128>}, {pipeline_mode = #tpu.pipeline_mode<synchronous>, transform_indices = @transform_4, window_bounds = array<i64: 1, 128>}, {transform_indices = @transform_5, window_bounds = array<i64: 8, 128>}]} {
    %c0 = arith.constant 0 : index
    %c0_0 = arith.constant 0 : index
    %0 = vector.load %arg1[%c0, %c0_0] : memref<8x20xf32, #tpu.memory_space<vmem>>, vector<8x20xf32>
    %c0_1 = arith.constant 0 : index
    %c0_2 = arith.constant 0 : index
    %1 = vector.load %arg2[%c0_1, %c0_2] : memref<20x256xf32, #tpu.memory_space<vmem>>, vector<20x256xf32>
    %cst = arith.constant dense<0.000000e+00> : vector<8x256xf32>
    %2 = tpu.matmul %0, %1, %cst {dimension_numbers = #tpu.dot_dimension_numbers<[1], [0], [0], [1], [0, 0, 1, 1], [], []>} : vector<8x20xf32>, vector<20x256xf32>, vector<8x256xf32> -> vector<8x256xf32>
    %c0_3 = arith.constant 0 : index
    %c0_4 = arith.constant 0 : index
    %3 = vector.load %arg3[%c0_3, %c0_4] : memref<1x256xf32, #tpu.memory_space<vmem>>, vector<1x256xf32>
    %4 = vector.broadcast %3 : vector<1x256xf32> to vector<8x256xf32>
    %5 = arith.addf %2, %4 : vector<8x256xf32>
    %cst_5 = arith.constant 0.000000e+00 : f32
    %6 = vector.broadcast %cst_5 : f32 to vector<8x256xf32>
    %7 = arith.maximumf %5, %6 : vector<8x256xf32>
    %c0_6 = arith.constant 0 : index
    %c0_7 = arith.constant 0 : index
    %8 = vector.load %arg4[%c0_6, %c0_7] : memref<256x128xf32, #tpu.memory_space<vmem>>, vector<256x128xf32>
    %cst_8 = arith.constant dense<0.000000e+00> : vector<8x128xf32>
    %9 = tpu.matmul %7, %8, %cst_8 {dimension_numbers = #tpu.dot_dimension_numbers<[1], [0], [0], [1], [0, 0, 1, 1], [], []>} : vector<8x256xf32>, vector<256x128xf32>, vector<8x128xf32> -> vector<8x128xf32>
    %c0_9 = arith.constant 0 : index
    %c0_10 = arith.constant 0 : index
    %10 = vector.load %arg5[%c0_9, %c0_10] : memref<1x128xf32, #tpu.memory_space<vmem>>, vector<1x128xf32>
    %11 = vector.broadcast %10 : vector<1x128xf32> to vector<8x128xf32>
    %12 = arith.addf %9, %11 : vector<8x128xf32>
    %c0_11 = arith.constant 0 : index
    %c0_12 = arith.constant 0 : index
    %13 = vector.load %arg6[%c0_11, %c0_12] : memref<8x128xf32, #tpu.memory_space<vmem>>, vector<8x128xf32>
    tpu.vector_store %arg6[%c0_11, %c0_12], %12 {strides = array<i32>} : memref<8x128xf32, #tpu.memory_space<vmem>>, vector<8x128xf32>,
    return
  }
  func.func @transform_0(%arg0: i32) -> (i32, i32) {
    %c0_i32 = arith.constant 0 : i32
    %c0_i32_0 = arith.constant 0 : i32
    return %arg0, %c0_i32 : i32, i32
  }
  func.func @transform_1(%arg0: i32) -> (i32, i32) {
    %c0_i32 = arith.constant 0 : i32
    %c0_i32_0 = arith.constant 0 : i32
    %c0_i32_1 = arith.constant 0 : i32
    return %c0_i32, %c0_i32_0 : i32, i32
  }
  func.func @transform_2(%arg0: i32) -> (i32, i32) {
    %c0_i32 = arith.constant 0 : i32
    %c0_i32_0 = arith.constant 0 : i32
    %c0_i32_1 = arith.constant 0 : i32
    return %c0_i32, %c0_i32_0 : i32, i32
  }
  func.func @transform_3(%arg0: i32) -> (i32, i32) {
    %c0_i32 = arith.constant 0 : i32
    %c0_i32_0 = arith.constant 0 : i32
    %c0_i32_1 = arith.constant 0 : i32
    return %c0_i32, %c0_i32_0 : i32, i32
  }
  func.func @transform_4(%arg0: i32) -> (i32, i32) {
    %c0_i32 = arith.constant 0 : i32
    %c0_i32_0 = arith.constant 0 : i32
    %c0_i32_1 = arith.constant 0 : i32
    return %c0_i32, %c0_i32_0 : i32, i32
  }
  func.func @transform_5(%arg0: i32) -> (i32, i32) {
    %c0_i32 = arith.constant 0 : i32
    %c0_i32_0 = arith.constant 0 : i32
    return %arg0, %c0_i32 : i32, i32
  }
}

</mosaic_0001>

<bundles_post_ra>
// kernel: tpu_custom_call.1
= control target key start
LH: loop header
LB: loop body
LE: loop exit
PB: predicated region body
PF: predicated region fallthrough
CT: control target
= control target key end

     0   :  { %10 = vsyncpa [#allocation3], 0  ;;  %s562_s0 = inlined_call_operand.hbm [shape: f32[8,20], index: 0, kind: input, shape index: {}]   ;;  %s563_s1 = inlined_call_operand.hbm [shape: f32[20,256], index: 1, kind: input, shape index: {}]   ;;  %s564_s2 = inlined_call_operand.vmem [shape: f32[1,256], index: 2, kind: input, shape index: {}]   ;;  %s565_s3 = inlined_call_operand.hbm [shape: f32[256,128], index: 3, kind: input, shape index: {}]   ;;  %s566_s4 = inlined_call_operand.vmem [shape: f32[1,128], index: 4, kind: input, shape index: {}]   ;;  %s567_s5 = inlined_call_operand.hbm [shape: f32[8,128], index: 5, kind: output, shape index: {}]  }
   0x1   :  { %11 = vsyncpa [#allocation6], 0 }
   0x2   :  { %12 = vsyncpa [#allocation4], 0  ;;  %s467_s18 = smov [#allocation5]   ;;  %s373_s22 = scalar_lea.hbm %s563_s1, 768 }
   0x3   :  { %s28_s19 = sshll.u32 %s467_s18, 4  ;;  %p374_p0 = scmp.ne.s32.totalorder %s563_s1, %s373_s22  ;;  %s29_s19 = int_to_ptr.vmem [resolvable:$true] %s28_s19 }
   0x4   :  { %p377_p1 = scmp.lt.u32.totalorder %s373_s22, %s563_s1 }
   0x6   :  { %p379_p2 = pnand %p377_p1, %p374_p0 }
   0x8   :  { %382 = shalt.err (!%p379_p2)
}
   0x9   :  { %s383_s27 = scalar_lea.vmem %s29_s19, 768  ;;  %p388_p4 = scmp.lt.s32.totalorder %s29_s19, %s29_s19 }
   0xa   :  { %p384_p3 = scmp.ne.s32.totalorder %s29_s19, %s383_s27  ;;  %p389_p5 = scmp.lt.s32.totalorder %s383_s27, %s383_s27 }
   0xc   :  { %p390_p6 = por %p389_p5, %p388_p4 }
   0xe   :  { %p391_p7 = pnand %p390_p6, %p384_p3 }
  0x10   :  { %394 = shalt.err (!%p391_p7)
}
  0x11   :  { %s468_s28 = smov 256   ;;  %s469_s29 = smov 16  }
  0x12   :  { %34 = dma.hbm_to_vmem [thread:$0]  %s563_s1, 768, %s29_s19, [#allocation6], %s468_s28, %s468_s28, %s469_s29  }
  0x13   :  { %s470_s7 = smov [#allocation2]   ;;  %s471_s9 = smov [#allocation7]  }
  0x14   :  { %s19_s8 = sshll.u32 %s470_s7, 4  ;;  %s42_s10 = sshll.u32 %s471_s9, 4  ;;  %s20_s8 = int_to_ptr.vmem [resolvable:$true] %s19_s8  ;;  %s43_s10 = int_to_ptr.vmem [resolvable:$true] %s42_s10 }
  0x15   :  { %s395_s13 = scalar_lea.hbm %s562_s0, 128 }
  0x16   :  { %p396_p8 = scmp.ne.s32.totalorder %s562_s0, %s395_s13  ;;  %p399_p9 = scmp.lt.u32.totalorder %s395_s13, %s562_s0 }
  0x18   :  { %p401_p10 = pnand %p399_p9, %p396_p8 }
  0x1a   :  { %404 = shalt.err (!%p401_p10)
}
  0x1b   :  { %s405_s1 = scalar_lea.vmem %s20_s8, 128  ;;  %p410_p12 = scmp.lt.s32.totalorder %s20_s8, %s20_s8 }
  0x1c   :  { %p406_p11 = scmp.ne.s32.totalorder %s20_s8, %s405_s1  ;;  %p411_p13 = scmp.lt.s32.totalorder %s405_s1, %s405_s1 }
  0x1e   :  { %p412_p0 = por %p411_p13, %p410_p12 }
  0x20   :  { %p413_p1 = pnand %p412_p0, %p406_p11 }
  0x22   :  { %416 = shalt.err (!%p413_p1)
}
  0x23   :  { %22 = dma.hbm_to_vmem [thread:$0]  %s562_s0, 128, %s20_s8, [#allocation3]  }
  0x24   :  { %s417_s22 = scalar_lea.hbm %s565_s3, 4096 }
  0x25   :  { %p418_p2 = scmp.ne.s32.totalorder %s565_s3, %s417_s22  ;;  %p421_p3 = scmp.lt.u32.totalorder %s417_s22, %s565_s3 }
  0x27   :  { %p423_p4 = pnand %p421_p3, %p418_p2 }
  0x29   :  { %426 = shalt.err (!%p423_p4)
}
  0x2a   :  { %s427_s27 = scalar_lea.vmem %s43_s10, 4096  ;;  %p432_p6 = scmp.lt.s32.totalorder %s43_s10, %s43_s10 }
  0x2b   :  { %p428_p5 = scmp.ne.s32.totalorder %s43_s10, %s427_s27  ;;  %p433_p7 = scmp.lt.s32.totalorder %s427_s27, %s427_s27 }
  0x2d   :  { %p434_p8 = por %p433_p7, %p432_p6 }
  0x2f   :  { %p435_p9 = pnand %p434_p8, %p428_p5 }
  0x31   :  { %438 = shalt.err (!%p435_p9)
}
  0x32   :  { %s472_s0 = smov 128   ;;  %s473_s28 = smov 8  }
  0x33   :  { %48 = dma.hbm_to_vmem [thread:$0]  %s565_s3, 4096, %s43_s10, [#allocation6], %s472_s0, %s472_s0, %s473_s28  }
  0x34   :  { %461 = dma.done.wait [#allocation3], 128  }
  0x35   :  { %462 = vsyncadd [#allocation3], 4294967168 }
  0x36   :  { %463 = dma.done.wait [#allocation6], 4864  }
  0x37   :  { %464 = vsyncadd [#allocation6], 4294962432  ;;  %v474_v0 = vmov 0.0   ;;  %v62_v1 = vld [vmem:[#allocation5 + $0x8] sm:$0xff]  ;;  %v64_v2 = vld [vmem:[#allocation5 + $0x18] sm:$0xff]  ;;  %vm83_vm0 = vcmask 1043456   ;;  %v69_v58 = vlaneseq }
  0x38   :  { %154 = vmatprep.mubr.f32.mxu0 %v474_v0  ;;  %v61_v3 = vld [vmem:[#allocation5] sm:$0xff]  ;;  %v328_v4 = vpack.c.bf16 %v64_v2, %v62_v1  ;;  %v63_v5 = vld [vmem:[#allocation5 + $0x10] sm:$0xff]  ;;  %v66_v7 = vld [vmem:[#allocation5 + $0x28] sm:$0xf]  ;;  %vm79_vm1 = vcmask 162816   ;;  %s475_s9 = smov [#allocation8]  }
  0x39   :  { %v330_v6 = vpack.c.bf16 %v63_v5, %v61_v3  ;;  %v179_v8 = vld [vmem:[#allocation7 + $0x80] sm:$0xff]  ;;  %v180_v9 = vld [vmem:[#allocation7 + $0x88] sm:$0xff]  ;;  %v181_v13 = vld [vmem:[#allocation7 + $0x90] sm:$0xff]  ;;  %v70_v59 = vshrl.u32 %v69_v58, 7  ;;  %s279_s10 = sshll.u32 %s475_s9, 4  ;;  %s280_s10 = int_to_ptr.vmem [resolvable:$true] %s279_s10 }
  0x3a   :  { %329 = vmatprep.subr.bf16.mxu0 %v328_v4  ;;  %v332_v10 = vpack.c.bf16 %v180_v9, %v179_v8  ;;  %v163_v11 = vld [vmem:[#allocation7] sm:$0xff]  ;;  %v164_v12 = vld [vmem:[#allocation7 + $0x8] sm:$0xff]  ;;  %v182_v15 = vld [vmem:[#allocation7 + $0x98] sm:$0xff]  ;;  %p444_p11 = scmp.lt.s32.totalorder %s280_s10, %s280_s10 }
  0x3b   :  { %331 = vmatpush1.bf16.msra.mxu0 %v330_v6  ;;  %v334_v14 = vpack.c.bf16 %v164_v12, %v163_v11  ;;  %v165_v16 = vld [vmem:[#allocation7 + $0x10] sm:$0xff]  ;;  %v166_v17 = vld [vmem:[#allocation7 + $0x18] sm:$0xff]  ;;  %v336_v19 = vpack.c.bf16 %v182_v15, %v181_v13  ;;  %v183_v20 = vld [vmem:[#allocation7 + $0xa0] sm:$0xff]  ;;  %v71_v60 = vsub.s32 0, %v70_v59  ;;  %v75_v62 = vsub.s32 1, %v70_v59 }
  0x3c   :  { %289 = vmatprep.subr.msk.mxu0 %vm83_vm0, %v66_v7  ;;  %v65_v18 = vld [vmem:[#allocation5 + $0x20] sm:$0xf]  ;;  %333 = vmatprep.subr.bf16.mxu1 %v332_v10  ;;  %v184_v21 = vld [vmem:[#allocation7 + $0xa8] sm:$0xff]  ;;  %v338_v23 = vpack.c.bf16 %v166_v17, %v165_v16  ;;  %v167_v25 = vld [vmem:[#allocation7 + $0x20] sm:$0xff] }
  0x3d   :  { %v60_v22 = vld [vmem:[#allocation2] sm:$0xff]  ;;  %335 = vmatpush3.bf16.msra.mxu1 %v334_v14  ;;  %v340_v24 = vpack.c.bf16 %v184_v21, %v183_v20  ;;  %v185_v27 = vld [vmem:[#allocation7 + $0xb0] sm:$0xff]  ;;  %v186_v28 = vld [vmem:[#allocation7 + $0xb8] sm:$0xff] }
  0x3e   :  { %337 = vmatprep.subr.bf16.mxu1 %v336_v19  ;;  %v168_v26 = vld [vmem:[#allocation7 + $0x28] sm:$0xff]  ;;  %v344_v30 = vpack.c.bf16 %v186_v28, %v185_v27  ;;  %v169_v31 = vld [vmem:[#allocation7 + $0x30] sm:$0xff]  ;;  %v170_v32 = vld [vmem:[#allocation7 + $0x38] sm:$0xff] }
  0x3f   :  { %290 = vmatpush1.msk.msra.mxu0 %vm83_vm0, %v65_v18  ;;  %v342_v29 = vpack.c.bf16 %v168_v26, %v167_v25  ;;  %v187_v33 = vld [vmem:[#allocation7 + $0xc0] sm:$0xff]  ;;  %v188_v34 = vld [vmem:[#allocation7 + $0xc8] sm:$0xff]  ;;  %v346_v35 = vpack.c.bf16 %v170_v32, %v169_v31  ;;  %v189_v39 = vld [vmem:[#allocation7 + $0xd0] sm:$0xff] }
  0x40   :  { %291 = vmatmul.mubr.msk.f32.vlgmr.msra.gmra.mrb[0].mxu0 %vm79_vm1, %v60_v22  ;;  %v348_v36 = vpack.c.bf16 %v188_v34, %v187_v33  ;;  %v171_v37 = vld [vmem:[#allocation7 + $0x40] sm:$0xff]  ;;  %v172_v38 = vld [vmem:[#allocation7 + $0x48] sm:$0xff]  ;;  %v190_v40 = vld [vmem:[#allocation7 + $0xd8] sm:$0xff] }
  0x41   :  { %339 = vmatpush3.bf16.msra.mxu1 %v338_v23  ;;  %v350_v41 = vpack.c.bf16 %v172_v38, %v171_v37  ;;  %v352_v42 = vpack.c.bf16 %v190_v40, %v189_v39  ;;  %v173_v43 = vld [vmem:[#allocation7 + $0x50] sm:$0xff]  ;;  %v174_v44 = vld [vmem:[#allocation7 + $0x58] sm:$0xff]  ;;  %v191_v45 = vld [vmem:[#allocation7 + $0xe0] sm:$0xff] }
  0x42   :  { %341 = vmatprep.subr.bf16.mxu1 %v340_v24  ;;  %v192_v46 = vld [vmem:[#allocation7 + $0xe8] sm:$0xff]  ;;  %v354_v47 = vpack.c.bf16 %v174_v44, %v173_v43  ;;  %v175_v49 = vld [vmem:[#allocation7 + $0x60] sm:$0xff]  ;;  %v193_v52 = vld [vmem:[#allocation7 + $0xf0] sm:$0xff] }
  0x43   :  { %v356_v48 = vpack.c.bf16 %v192_v46, %v191_v45  ;;  %v176_v50 = vld [vmem:[#allocation7 + $0x68] sm:$0xff]  ;;  %v194_v53 = vld [vmem:[#allocation7 + $0xf8] sm:$0xff]  ;;  %v177_v55 = vld [vmem:[#allocation7 + $0x70] sm:$0xff] }
  0x44   :  { %v358_v51 = vpack.c.bf16 %v176_v50, %v175_v49  ;;  %v360_v54 = vpack.c.bf16 %v194_v53, %v193_v52  ;;  %v178_v56 = vld [vmem:[#allocation7 + $0x78] sm:$0xff]  ;;  %v67_v61 = vld [vmem:[%s564_s2] sm:$0x3]  ;;  %s439_s2 = scalar_lea.vmem %s280_s10, 128 }
  0x45   :  { %343 = vmatpush3.bf16.msra.mxu1 %v342_v29  ;;  %v362_v57 = vpack.c.bf16 %v178_v56, %v177_v55  ;;  %v72_v63 = vrot.slane %v67_v61, %v71_v60  ;;  %v76_v0 = vrot.slane %v67_v61, %v75_v62  ;;  %v292_v8 = vld [vmem:[%s566_s4] ss:$0 sm:$0xff]  ;;  %p440_p10 = scmp.ne.s32.totalorder %s280_s10, %s439_s2  ;;  %p445_p12 = scmp.lt.s32.totalorder %s439_s2, %s439_s2 }
  0x46   :  { %345 = vmatprep.subr.bf16.mxu1 %v344_v30 }
  0x47   :  { %p446_p13 = por %p445_p12, %p444_p11 }
  0x49   :  { %347 = vmatpush3.bf16.msra.mxu1 %v346_v35  ;;  %p447_p0 = pnand %p446_p13, %p440_p10 }
  0x4a   :  { %349 = vmatprep.subr.bf16.mxu1 %v348_v36 }
  0x4d   :  { %351 = vmatpush3.bf16.msra.mxu1 %v350_v41 }
  0x4e   :  { %353 = vmatprep.subr.bf16.mxu1 %v352_v42 }
  0x51   :  { %355 = vmatpush3.bf16.msra.mxu1 %v354_v47 }
  0x52   :  { %357 = vmatprep.subr.bf16.mxu1 %v356_v48 }
  0x55   :  { %359 = vmatpush3.bf16.msra.mxu1 %v358_v51 }
  0x56   :  { %361 = vmatprep.subr.bf16.mxu1 %v360_v54 }
  0x59   :  { %363 = vmatpush3.bf16.msra.mxu1 %v362_v57 }
 0x113   :  { %v156_v1 = vpop.f32.mrb[0].mxu0 }
 0x114   :  { %v157_v2 = vadd.f32 %v156_v1, %v72_v63  ;;  %v158_v3 = vpop.f32.mrb[1].mxu0 }
 0x115   :  { %v159_v4 = vadd.f32 %v158_v3, %v76_v0 }
 0x116   :  { %v161_v6 = vmax.f32 %v157_v2, 0.0 }
 0x117   :  { %v162_v5 = vmax.f32 %v159_v4, 0.0 }
 0x119   :  { %266 = vmatprep.mubr.f32.mxu1 %v162_v5 }
 0x11a   :  { %267 = vmatmul.mubr.f32.vlgmr.msra.gmra.mrb[0].mxu1 %v161_v6 }
 0x1ed   :  { %v325_v7 = vpop.f32.mrb[0].mxu1 }
 0x1ee   :  { %v326_v9 = vpop.f32.mrb[1].mxu1 }
 0x1ef   :  { %v327_v10 = vadd.f32 %v326_v9, %v325_v7 }
 0x1f1   :  { %v269_v11 = vadd.f32 %v327_v10, %v292_v8 }
 0x1f3   :  { %272 = vst [vmem:[#allocation8] sm:$0xff] %v269_v11 }
 0x1f4   :  { %450 = shalt.err (!%p447_p0)
}
 0x1f5   :  { %s451_s13 = scalar_lea.hbm %s567_s5, 128 }
 0x1f6   :  { %p452_p1 = scmp.ne.s32.totalorder %s567_s5, %s451_s13  ;;  %p455_p2 = scmp.lt.u32.totalorder %s451_s13, %s567_s5 }
 0x1f8   :  { %p457_p3 = pnand %p455_p2, %p452_p1 }
 0x1fa   :  { %460 = shalt.err (!%p457_p3)
}
 0x1fb   :  { %282 = dma.vmem_to_hbm [thread:$0]  %s280_s10, 128, %s567_s5, [#allocation4]  }
 0x1fc   :  { %465 = dma.done.wait [#allocation4], 128  }
 0x1fd   :  { %466 = vsyncadd [#allocation4], 4294967168 }
 0x1fe   :  { %286 = vsyncpa [#allocation3], 1 }
 0x1ff   :  { %287 = vsyncpa [#allocation6], 1 }
 0x200   :  { %288 = vsyncpa [#allocation4], 1 }

</bundles_post_ra>
